<compile_context>
chip_gen: v5e
topology: v5e:2x2
jax: 0.10.0
libtpu: 0.0.40
codegen_flags: <defaults>
</compile_context>

<pallas_src>
import jax
import jax.numpy as jnp
from jax.experimental import pallas as pl
from jax.experimental.pallas import tpu as pltpu

DELTA = 1e-3    # DND inverse-distance kernel smoothing constant
LANE = 128      # lane width for the padded, lane-dense output slab


# ----------------------------- Pallas kernel ------------------------------- #

def sfnec_kernel(x_ref, w1_ref, b1_ref, w2_ref, b2_ref,
                 mkT_ref, mksq_ref, mv_bd_ref, ind_ref, psi_ref):
    """Fused SFNEC forward: embedding MLP + all-action DND lookups.

    TODO(synk): the torch module's embedding_net is arbitrary; a 2-layer MLP
    stands in here.  Real NEC also uses an approximate top-k (kd-tree)
    neighbor lookup; this kernel attends over the full memory (exact when
    p >= memory size).
    """
    # ---- embedding net: q = relu(x @ W1 + b1) @ W2 + b2 ----
    x = x_ref[...]                                                    # (B, D)
    h = jnp.dot(x, w1_ref[...], preferred_element_type=jnp.float32) + b1_ref[...]
    h = jnp.maximum(h, 0.0)
    q = jnp.dot(h, w2_ref[...], preferred_element_type=jnp.float32) + b2_ref[...]  # (B, K)

    # ---- squared distances to ALL actions' memory keys in one matmul ----
    # Keys are pre-transposed at DND-write time -> standard (B,K)x(K,A*M) feed.
    cross = jnp.dot(q, mkT_ref[...], preferred_element_type=jnp.float32)   # (B, A*M)
    qq = jnp.sum(q * q, axis=-1, keepdims=True)                            # (B, 1)
    d2 = jnp.maximum(qq + mksq_ref[...] - 2.0 * cross, 0.0)                # (B, A*M)
    dd = d2 + DELTA

    # EUP approximate reciprocal seed + one Newton-Raphson step (f32).
    r = pl.reciprocal(dd, approx=True)
    kern = r * (2.0 - dd * r)                                              # ~1/(d2+delta)

    # ---- all-action normalization + weighted SF sum via two matmuls ----
    # mv_bd: block-diagonal (A*M, PAD) SF values; ind: (A*M, PAD) per-action
    # one-hot column blocks (pad columns = 1 so the division stays finite).
    numer = jnp.dot(kern, mv_bd_ref[...], preferred_element_type=jnp.float32)  # (B, PAD)
    denom = jnp.dot(kern, ind_ref[...], preferred_element_type=jnp.float32)    # (B, PAD)
    psi_ref[...] = numer / denom                              # one lane-dense store


# --------------------- DND-write-time memory preprocessing ----------------- #

def prepare_memory(mem_keys, mem_vals):
    """Precompute memory-side operands.  Call ONLY when the DNDs change.

    Returns (mk_T, mk_sq, mv_blockdiag, indicator, n_actions, sf_dim).
    """
    A, M, K = mem_keys.shape
    S = mem_vals.shape[-1]
    pad_w = max(LANE, ((A * S + LANE - 1) // LANE) * LANE)     # lane-dense width

    mk_flat = mem_keys.reshape(A * M, K).astype(jnp.float32)   # (A*M, K)
    mk_T = mk_flat.T                                           # (K, A*M)
    mk_sq = jnp.sum(mk_flat * mk_flat, axis=-1).reshape(1, A * M)

    mv_flat = mem_vals.reshape(A * M, S).astype(jnp.float32)   # (A*M, S)
    row_action = jnp.arange(A * M) // M                        # (A*M,)
    col_action = jnp.arange(A * S) // S                        # (A*S,)
    mask = (row_action[:, None] == col_action[None, :]).astype(jnp.float32)  # (A*M, A*S)
    mv_bd_real = jnp.tile(mv_flat, (1, A)) * mask              # block-diagonal values
    ind_real = mask                                            # per-action indicator

    pad = pad_w - A * S
    mv_bd = jnp.concatenate([mv_bd_real, jnp.zeros((A * M, pad), jnp.float32)], axis=-1)
    ind = jnp.concatenate([ind_real, jnp.ones((A * M, pad), jnp.float32)], axis=-1)

    return (mk_T, mk_sq, mv_bd, ind, A, S)


# ------------------------------ JAX wrapper -------------------------------- #

def sfnec_forward(obs, embed_params, memory):
    """Forward pass of SFNEC: obs (B, C, H, W) -> psis (B, n_actions, sf_dim)."""
    w1, b1, w2, b2 = embed_params
    mk_T, mk_sq, mv_bd, ind, A, S = memory
    B = obs.shape[0]
    D = w1.shape[0]
    pad_w = mv_bd.shape[-1]

    x = obs.reshape(B, D).astype(jnp.float32)

    vmem = pl.BlockSpec(memory_space=pltpu.MemorySpace.VMEM)
    psi_slab = pl.pallas_call(
        sfnec_kernel,
        out_shape=jax.ShapeDtypeStruct((B, pad_w), jnp.float32),
        in_specs=[vmem] * 9,
        out_specs=vmem,
    )(x, w1, b1, w2, b2, mk_T, mk_sq, mv_bd, ind)

    # (B, PAD) -> (B, A, S); matches torch.transpose(torch.stack(psis), 0, 1).
    return psi_slab[:, :A * S].reshape(B, A, S)


def reference_forward(obs, params):
    """Pure-JAX reference for correctness checking."""
    w1, b1, w2, b2, mem_keys, mem_vals = params
    B = obs.shape[0]
    x = obs.reshape(B, -1).astype(jnp.float32)
    h = jnp.maximum(x @ w1 + b1, 0.0)
    keys = h @ w2 + b2                                               # (B, K)
    d2 = (
        jnp.sum(keys ** 2, -1)[None, :, None]
        + jnp.sum(mem_keys ** 2, -1)[:, None, :]
        - 2.0 * jnp.einsum("bk,amk->abm", keys, mem_keys)
    )                                                                # (A, B, M)
    d2 = jnp.maximum(d2, 0.0)
    kern = 1.0 / (d2 + DELTA)
    w = kern / jnp.sum(kern, -1, keepdims=True)
    psis = jnp.einsum("abm,ams->abs", w, mem_vals)                   # (A, B, S)
    return jnp.transpose(psis, (1, 0, 2))                            # (B, A, S)


# --------------------------------- main ------------------------------------ #

if __name__ == "__main__":
    # Small shapes consistent with the module.
    B, C, Himg, Wimg = 2, 4, 8, 8       # observations (NCHW)
    D = C * Himg * Wimg                 # flattened obs dim = 256
    HID = 64                            # embedding hidden dim
    K = 32                              # key (embedding) dim
    A = 4                               # n_actions
    M = 64                              # DND memory entries per action
    S = 8                               # successor-feature dim

    root = jax.random.PRNGKey(0)
    k_obs, k_w1, k_b1, k_w2, k_b2, k_mk, k_mv = jax.random.split(root, 7)

    obs = jax.random.normal(k_obs, (B, C, Himg, Wimg), dtype=jnp.float32)

    # Deterministic synthetic parameters (no checkpoint loading).
    w1 = jax.random.normal(k_w1, (D, HID), dtype=jnp.float32) * 0.05
    b1 = jax.random.normal(k_b1, (1, HID), dtype=jnp.float32) * 0.01
    w2 = jax.random.normal(k_w2, (HID, K), dtype=jnp.float32) * 0.05
    b2 = jax.random.normal(k_b2, (1, K), dtype=jnp.float32) * 0.01
    mem_keys = jax.random.normal(k_mk, (A, M, K), dtype=jnp.float32)
    mem_vals = jax.random.normal(k_mv, (A, M, S), dtype=jnp.float32)

    embed_params = (w1, b1, w2, b2)

    # Memory-side precomputes happen at DND-write time, NOT per forward call.
    memory = jax.tree_util.tree_map(
        jax.block_until_ready,
        prepare_memory(mem_keys, mem_vals)[:4],
    ) + (A, S)

    psis = jax.block_until_ready(sfnec_forward(obs, embed_params, memory))
    ref = jax.block_until_ready(
        reference_forward(obs, (w1, b1, w2, b2, mem_keys, mem_vals)))

    assert psis.shape == (B, A, S), psis.shape
    assert jnp.allclose(psis, ref, atol=1e-4, rtol=1e-4), "mismatch vs reference"

    print("KERNEL_OK")
</pallas_src>

<mosaic_0001>
module attributes {stable_mosaic.version = 11 : i64} {
  func.func @sfnec_kernel(%arg0: memref<2x256xf32, #tpu.memory_space<vmem>>, %arg1: memref<256x64xf32, #tpu.memory_space<vmem>>, %arg2: memref<1x64xf32, #tpu.memory_space<vmem>>, %arg3: memref<64x32xf32, #tpu.memory_space<vmem>>, %arg4: memref<1x32xf32, #tpu.memory_space<vmem>>, %arg5: memref<32x256xf32, #tpu.memory_space<vmem>>, %arg6: memref<1x256xf32, #tpu.memory_space<vmem>>, %arg7: memref<256x128xf32, #tpu.memory_space<vmem>>, %arg8: memref<256x128xf32, #tpu.memory_space<vmem>>, %arg9: memref<2x128xf32, #tpu.memory_space<vmem>>) attributes {dimension_semantics = [], scalar_prefetch = 0 : i64, scratch_operands = 0 : i64, tpu.core_type = #tpu.core_type<tc>} {
    %c0 = arith.constant 0 : index
    %c0_0 = arith.constant 0 : index
    %0 = vector.load %arg0[%c0, %c0_0] : memref<2x256xf32, #tpu.memory_space<vmem>>, vector<2x256xf32>
    %c0_1 = arith.constant 0 : index
    %c0_2 = arith.constant 0 : index
    %1 = vector.load %arg1[%c0_1, %c0_2] : memref<256x64xf32, #tpu.memory_space<vmem>>, vector<256x64xf32>
    %cst = arith.constant dense<0.000000e+00> : vector<2x64xf32>
    %2 = tpu.matmul %0, %1, %cst {dimension_numbers = #tpu.dot_dimension_numbers<[1], [0], [0], [1], [0, 0, 1, 1], [], []>} : vector<2x256xf32>, vector<256x64xf32>, vector<2x64xf32> -> vector<2x64xf32>
    %c0_3 = arith.constant 0 : index
    %c0_4 = arith.constant 0 : index
    %3 = vector.load %arg2[%c0_3, %c0_4] : memref<1x64xf32, #tpu.memory_space<vmem>>, vector<1x64xf32>
    %4 = vector.broadcast %3 : vector<1x64xf32> to vector<2x64xf32>
    %5 = arith.addf %2, %4 : vector<2x64xf32>
    %cst_5 = arith.constant 0.000000e+00 : f32
    %6 = vector.broadcast %cst_5 : f32 to vector<2x64xf32>
    %7 = arith.maximumf %5, %6 : vector<2x64xf32>
    %c0_6 = arith.constant 0 : index
    %c0_7 = arith.constant 0 : index
    %8 = vector.load %arg3[%c0_6, %c0_7] : memref<64x32xf32, #tpu.memory_space<vmem>>, vector<64x32xf32>
    %cst_8 = arith.constant dense<0.000000e+00> : vector<2x32xf32>
    %9 = tpu.matmul %7, %8, %cst_8 {dimension_numbers = #tpu.dot_dimension_numbers<[1], [0], [0], [1], [0, 0, 1, 1], [], []>} : vector<2x64xf32>, vector<64x32xf32>, vector<2x32xf32> -> vector<2x32xf32>
    %c0_9 = arith.constant 0 : index
    %c0_10 = arith.constant 0 : index
    %10 = vector.load %arg4[%c0_9, %c0_10] : memref<1x32xf32, #tpu.memory_space<vmem>>, vector<1x32xf32>
    %11 = vector.broadcast %10 : vector<1x32xf32> to vector<2x32xf32>
    %12 = arith.addf %9, %11 : vector<2x32xf32>
    %c0_11 = arith.constant 0 : index
    %c0_12 = arith.constant 0 : index
    %13 = vector.load %arg5[%c0_11, %c0_12] : memref<32x256xf32, #tpu.memory_space<vmem>>, vector<32x256xf32>
    %cst_13 = arith.constant dense<0.000000e+00> : vector<2x256xf32>
    %14 = tpu.matmul %12, %13, %cst_13 {dimension_numbers = #tpu.dot_dimension_numbers<[1], [0], [0], [1], [0, 0, 1, 1], [], []>} : vector<2x32xf32>, vector<32x256xf32>, vector<2x256xf32> -> vector<2x256xf32>
    %15 = arith.mulf %12, %12 : vector<2x32xf32>
    %cst_14 = arith.constant dense<0.000000e+00> : vector<2xf32>
    %16 = vector.multi_reduction <add>, %15, %cst_14 [1] : vector<2x32xf32> to vector<2xf32>
    %17 = vector.shape_cast %16 : vector<2xf32> to vector<2x1xf32>
    %c0_15 = arith.constant 0 : index
    %c0_16 = arith.constant 0 : index
    %18 = vector.load %arg6[%c0_15, %c0_16] : memref<1x256xf32, #tpu.memory_space<vmem>>, vector<1x256xf32>
    %19 = vector.broadcast %17 : vector<2x1xf32> to vector<2x256xf32>
    %20 = vector.broadcast %18 : vector<1x256xf32> to vector<2x256xf32>
    %21 = arith.addf %19, %20 : vector<2x256xf32>
    %cst_17 = arith.constant 2.000000e+00 : f32
    %22 = vector.broadcast %cst_17 : f32 to vector<2x256xf32>
    %23 = arith.mulf %22, %14 : vector<2x256xf32>
    %24 = arith.subf %21, %23 : vector<2x256xf32>
    %cst_18 = arith.constant 0.000000e+00 : f32
    %25 = vector.broadcast %cst_18 : f32 to vector<2x256xf32>
    %26 = arith.maximumf %24, %25 : vector<2x256xf32>
    %cst_19 = arith.constant 1.000000e-03 : f32
    %27 = vector.broadcast %cst_19 : f32 to vector<2x256xf32>
    %28 = arith.addf %26, %27 : vector<2x256xf32>
    %29 = tpu.reciprocal %28 {approx = true} : vector<2x256xf32> -> vector<2x256xf32>
    %30 = arith.mulf %28, %29 : vector<2x256xf32>
    %cst_20 = arith.constant 2.000000e+00 : f32
    %31 = vector.broadcast %cst_20 : f32 to vector<2x256xf32>
    %32 = arith.subf %31, %30 : vector<2x256xf32>
    %33 = arith.mulf %29, %32 : vector<2x256xf32>
    %c0_21 = arith.constant 0 : index
    %c0_22 = arith.constant 0 : index
    %34 = vector.load %arg7[%c0_21, %c0_22] : memref<256x128xf32, #tpu.memory_space<vmem>>, vector<256x128xf32>
    %cst_23 = arith.constant dense<0.000000e+00> : vector<2x128xf32>
    %35 = tpu.matmul %33, %34, %cst_23 {dimension_numbers = #tpu.dot_dimension_numbers<[1], [0], [0], [1], [0, 0, 1, 1], [], []>} : vector<2x256xf32>, vector<256x128xf32>, vector<2x128xf32> -> vector<2x128xf32>
    %c0_24 = arith.constant 0 : index
    %c0_25 = arith.constant 0 : index
    %36 = vector.load %arg8[%c0_24, %c0_25] : memref<256x128xf32, #tpu.memory_space<vmem>>, vector<256x128xf32>
    %cst_26 = arith.constant dense<0.000000e+00> : vector<2x128xf32>
    %37 = tpu.matmul %33, %36, %cst_26 {dimension_numbers = #tpu.dot_dimension_numbers<[1], [0], [0], [1], [0, 0, 1, 1], [], []>} : vector<2x256xf32>, vector<256x128xf32>, vector<2x128xf32> -> vector<2x128xf32>
    %38 = arith.divf %35, %37 : vector<2x128xf32>
    %c0_27 = arith.constant 0 : index
    %c0_28 = arith.constant 0 : index
    %39 = vector.load %arg9[%c0_27, %c0_28] : memref<2x128xf32, #tpu.memory_space<vmem>>, vector<2x128xf32>
    tpu.vector_store %arg9[%c0_27, %c0_28], %38 {strides = array<i32>} : memref<2x128xf32, #tpu.memory_space<vmem>>, vector<2x128xf32>,
    return
  }
}

</mosaic_0001>

<bundles_post_ra>
// kernel: tpu_custom_call.1
= control target key start
LH: loop header
LB: loop body
LE: loop exit
PB: predicated region body
PF: predicated region fallthrough
CT: control target
= control target key end

     0   :  { %14 = vsyncpa [#allocation3], 0  ;;  %s806_s0 = inlined_call_operand.vmem [shape: f32[2,256], index: 0, kind: input, shape index: {}]   ;;  %s807_s1 = inlined_call_operand.vmem [shape: f32[256,64], index: 1, kind: input, shape index: {}]   ;;  %s808_s2 = inlined_call_operand.vmem [shape: f32[1,64], index: 2, kind: input, shape index: {}]   ;;  %s809_s3 = inlined_call_operand.vmem [shape: f32[64,32], index: 3, kind: input, shape index: {}]   ;;  %s810_s4 = inlined_call_operand.vmem [shape: f32[1,32], index: 4, kind: input, shape index: {}]   ;;  %s811_s5 = inlined_call_operand.vmem [shape: f32[32,256], index: 5, kind: input, shape index: {}]   ;;  %s812_s6 = inlined_call_operand.vmem [shape: f32[1,256], index: 6, kind: input, shape index: {}]   ;;  %s813_s7 = inlined_call_operand.vmem [shape: f32[256,128], index: 7, kind: input, shape index: {}]   ;;  %s814_s8 = inlined_call_operand.hbm [shape: f32[256,128], index: 8, kind: input, shape index: {}]   ;;  %s815_s9 = inlined_call_operand.hbm [shape: f32[2,128], index: 9, kind: output, shape index: {}]  }
   0x1   :  { %15 = vsyncpa [#allocation4], 0  ;;  %s36_s11 = sshll.u32 %s814_s8, 4  ;;  %s494_s12 = smov [#allocation2]   ;;  %s37_s11 = int_to_ptr.hbm [resolvable:$true] %s36_s11 }
   0x2   :  { %s38_s13 = sshll.u32 %s494_s12, 4  ;;  %s495_s14 = smov 128   ;;  %s39_s13 = int_to_ptr.vmem [resolvable:$true] %s38_s13 }
   0x3   :  { %s496_s15 = smov 8  }
   0x4   :  { %44 = dma.hbm_to_vmem [thread:$0]  %s37_s11, 4096, %s39_s13, [#allocation3], %s495_s14, %s495_s14, %s496_s15  }
   0x5   :  { %490 = dma.done.wait [#allocation3], 4096  }
   0x6   :  { %491 = vsyncadd [#allocation3], 4294963200  ;;  %v65_v0 = vld [vmem:[%s807_s1 + $0x78] sm:$0xff]  ;;  %v64_v1 = vld [vmem:[%s807_s1 + $0x70] sm:$0xff]  ;;  %vm145_vm0 = vcmask 523264   ;;  %vm177_vm1 = vcmask 261120  }
   0x7   :  { %v81_v2 = vld [vmem:[%s807_s1 + $0xf8] sm:$0xff]  ;;  %92 = vmatpush.msra.mxu0 %v65_v0  ;;  %v80_v3 = vld [vmem:[%s807_s1 + $0xf0] sm:$0xff]  ;;  %v63_v4 = vld [vmem:[%s807_s1 + $0x68] sm:$0xff]  ;;  %vm222_vm2 = vcmask 254976   ;;  %s417_s10 = sshll.u32 %s815_s9, 4  ;;  %s418_s10 = int_to_ptr.hbm [resolvable:$true] %s417_s10 }
   0x8   :  { %112 = vmatpush.msra.mxu1 %v81_v2  ;;  %v79_v5 = vld [vmem:[%s807_s1 + $0xe8] sm:$0xff]  ;;  %v62_v6 = vld [vmem:[%s807_s1 + $0x60] sm:$0xff]  ;;  %v61_v8 = vld [vmem:[%s807_s1 + $0x58] sm:$0xff] }
   0x9   :  { %93 = vmatpush.msra.mxu0 %v64_v1  ;;  %v78_v7 = vld [vmem:[%s807_s1 + $0xe0] sm:$0xff]  ;;  %v77_v9 = vld [vmem:[%s807_s1 + $0xd8] sm:$0xff]  ;;  %v60_v10 = vld [vmem:[%s807_s1 + $0x50] sm:$0xff] }
   0xa   :  { %113 = vmatpush.msra.mxu1 %v80_v3  ;;  %v76_v11 = vld [vmem:[%s807_s1 + $0xd0] sm:$0xff]  ;;  %v59_v12 = vld [vmem:[%s807_s1 + $0x48] sm:$0xff]  ;;  %v49_v14 = vld [vmem:[%s806_s0] sm:$0xf] }
   0xb   :  { %94 = vmatpush.msra.mxu0 %v63_v4  ;;  %v75_v13 = vld [vmem:[%s807_s1 + $0xc8] sm:$0xff]  ;;  %87 = vst [vmem:[#allocation1] ss:$4 sm:$0xff] %v49_v14  ;;  %v140_v15 = vld [vmem:[%s809_s3 + $0x38] sm:$0xff]  ;;  %v139_v16 = vld [vmem:[%s809_s3 + $0x30] sm:$0xff] }
   0xc   :  { %114 = vmatpush.msra.mxu1 %v79_v5  ;;  %v58_v17 = vld [vmem:[%s807_s1 + $0x40] sm:$0xff]  ;;  %157 = vmatpush.msra.mxu2 %v140_v15  ;;  %v138_v19 = vld [vmem:[%s809_s3 + $0x28] sm:$0xff]  ;;  %v57_v20 = vld [vmem:[%s807_s1 + $0x38] sm:$0xff] }
   0xd   :  { %95 = vmatpush.msra.mxu0 %v62_v6  ;;  %v74_v18 = vld [vmem:[%s807_s1 + $0xc0] sm:$0xff]  ;;  %v73_v21 = vld [vmem:[%s807_s1 + $0xb8] sm:$0xff]  ;;  %v56_v23 = vld [vmem:[%s807_s1 + $0x30] sm:$0xff] }
   0xe   :  { %115 = vmatpush.msra.mxu1 %v78_v7  ;;  %158 = vmatpush.msra.mxu2 %v139_v16  ;;  %v137_v22 = vld [vmem:[%s809_s3 + $0x20] sm:$0xff]  ;;  %v72_v24 = vld [vmem:[%s807_s1 + $0xb0] sm:$0xff]  ;;  %v55_v25 = vld [vmem:[%s807_s1 + $0x28] sm:$0xff] }
   0xf   :  { %96 = vmatpush.msra.mxu0 %v61_v8  ;;  %v71_v26 = vld [vmem:[%s807_s1 + $0xa8] sm:$0xff]  ;;  %v54_v27 = vld [vmem:[%s807_s1 + $0x20] sm:$0xff]  ;;  %v53_v29 = vld [vmem:[%s807_s1 + $0x18] sm:$0xff] }
  0x10   :  { %116 = vmatpush.msra.mxu1 %v77_v9  ;;  %159 = vmatpush.msra.mxu2 %v138_v19  ;;  %v70_v28 = vld [vmem:[%s807_s1 + $0xa0] sm:$0xff]  ;;  %v69_v30 = vld [vmem:[%s807_s1 + $0x98] sm:$0xff]  ;;  %v52_v31 = vld [vmem:[%s807_s1 + $0x10] sm:$0xff] }
  0x11   :  { %97 = vmatpush.msra.mxu0 %v60_v10  ;;  %v68_v32 = vld [vmem:[%s807_s1 + $0x90] sm:$0xff]  ;;  %v51_v33 = vld [vmem:[%s807_s1 + $0x8] sm:$0xff]  ;;  %v50_v35 = vld [vmem:[%s807_s1] sm:$0xff] }
  0x12   :  { %117 = vmatpush.msra.mxu1 %v76_v11  ;;  %160 = vmatpush.msra.mxu2 %v137_v22  ;;  %v67_v34 = vld [vmem:[%s807_s1 + $0x88] sm:$0xff]  ;;  %v66_v36 = vld [vmem:[%s807_s1 + $0x80] sm:$0xff]  ;;  %v136_v39 = vld [vmem:[%s809_s3 + $0x18] sm:$0xff] }
  0x13   :  { %98 = vmatpush.msra.mxu0 %v59_v12  ;;  %v88_v37 = vld.sshfl [vmem:[#allocation1] sm:$0xff pattern:$0x73625140]  ;;  %v89_v38 = vld.sshfl [vmem:[#allocation1 + $0x8] sm:$0xff pattern:$0x73625140] }
  0x14   :  { %118 = vmatpush.msra.mxu1 %v75_v13  ;;  %161 = vmatpush.msra.mxu2 %v136_v39  ;;  %v135_v40 = vld [vmem:[%s809_s3 + $0x10] sm:$0xff]  ;;  %v134_v41 = vld [vmem:[%s809_s3 + $0x8] sm:$0xff]  ;;  %v133_v42 = vld [vmem:[%s809_s3] sm:$0xff] }
  0x15   :  { %99 = vmatpush.msra.mxu0 %v58_v17  ;;  %v175_v43 = vld [vmem:[%s811_s5 + $0x30] sm:$0xff]  ;;  %v173_v44 = vld [vmem:[%s811_s5 + $0x20] sm:$0xff]  ;;  %v176_v53 = vld [vmem:[%s811_s5 + $0x38] sm:$0xff] }
  0x16   :  { %119 = vmatpush.msra.mxu1 %v74_v18  ;;  %162 = vmatpush.msra.mxu2 %v135_v40  ;;  %v434_v45 = vld [vmem:[%s808_s2] ss:$0 sm:$0xff]  ;;  %v171_v51 = vld [vmem:[%s811_s5 + $0x10] sm:$0xff]  ;;  %v174_v54 = vld [vmem:[%s811_s5 + $0x28] sm:$0xff] }
  0x17   :  { %100 = vmatpush.msra.mxu0 %v57_v20  ;;  %193 = vmatpush.msra.mxu3 %v175_v43  ;;  %v169_v52 = vld [vmem:[%s811_s5] sm:$0xff]  ;;  %v172_v55 = vld [vmem:[%s811_s5 + $0x18] sm:$0xff]  ;;  %v170_v56 = vld [vmem:[%s811_s5 + $0x8] sm:$0xff] }
  0x18   :  { %120 = vmatpush.msra.mxu1 %v73_v21  ;;  %163 = vmatpush.msra.mxu2 %v134_v41  ;;  %v435_v57 = vld [vmem:[%s810_s4] ss:$0 sm:$0xff]  ;;  %v265_v62 = vld [vmem:[%s813_s7 + $0x78] sm:$0xff]  ;;  %v264_v0 = vld [vmem:[%s813_s7 + $0x70] sm:$0xff] }
  0x19   :  { %101 = vmatpush.msra.mxu0 %v56_v23  ;;  %194 = vmatpush.msra.mxu3 %v173_v44  ;;  %v337_v63 = vld [vmem:[#allocation2 + $0x78] sm:$0xff]  ;;  %v336_v1 = vld [vmem:[#allocation2 + $0x70] sm:$0xff]  ;;  %v263_v2 = vld [vmem:[%s813_s7 + $0x68] sm:$0xff] }
  0x1a   :  { %121 = vmatpush.msra.mxu1 %v72_v24  ;;  %164 = vmatpush.msra.mxu2 %v133_v42  ;;  %v335_v3 = vld [vmem:[#allocation2 + $0x68] sm:$0xff]  ;;  %v281_v4 = vld [vmem:[%s813_s7 + $0xf8] sm:$0xff]  ;;  %v353_v5 = vld [vmem:[#allocation2 + $0xf8] sm:$0xff] }
  0x1b   :  { %102 = vmatpush.msra.mxu0 %v55_v25  ;;  %195 = vmatpush.msra.mxu3 %v171_v51  ;;  %v262_v6 = vld [vmem:[%s813_s7 + $0x60] sm:$0xff]  ;;  %v334_v7 = vld [vmem:[#allocation2 + $0x60] sm:$0xff]  ;;  %v261_v8 = vld [vmem:[%s813_s7 + $0x58] sm:$0xff] }
  0x1c   :  { %122 = vmatpush.msra.mxu1 %v71_v26  ;;  %282 = vmatpush.msrb.mxu2 %v265_v62  ;;  %v333_v9 = vld [vmem:[#allocation2 + $0x58] sm:$0xff]  ;;  %v260_v10 = vld [vmem:[%s813_s7 + $0x50] sm:$0xff]  ;;  %v332_v12 = vld [vmem:[#allocation2 + $0x50] sm:$0xff] }
  0x1d   :  { %103 = vmatpush.msra.mxu0 %v54_v27  ;;  %196 = vmatpush.msra.mxu3 %v169_v52  ;;  %v280_v11 = vld [vmem:[%s813_s7 + $0xf0] sm:$0xff]  ;;  %v352_v13 = vld [vmem:[#allocation2 + $0xf0] sm:$0xff]  ;;  %v259_v14 = vld [vmem:[%s813_s7 + $0x48] sm:$0xff] }
  0x1e   :  { %123 = vmatpush.msra.mxu1 %v70_v28  ;;  %283 = vmatpush.msrb.mxu2 %v264_v0  ;;  %v279_v15 = vld [vmem:[%s813_s7 + $0xe8] sm:$0xff]  ;;  %v331_v16 = vld [vmem:[#allocation2 + $0x48] sm:$0xff]  ;;  %v258_v18 = vld [vmem:[%s813_s7 + $0x40] sm:$0xff] }
  0x1f   :  { %104 = vmatpush.msra.mxu0 %v53_v29  ;;  %213 = vmatpush.msrb.mxu3 %v176_v53  ;;  %v351_v17 = vld [vmem:[#allocation2 + $0xe8] sm:$0xff]  ;;  %v278_v19 = vld [vmem:[%s813_s7 + $0xe0] sm:$0xff]  ;;  %v330_v20 = vld [vmem:[#allocation2 + $0x40] sm:$0xff] }
  0x20   :  { %124 = vmatpush.msra.mxu1 %v69_v30  ;;  %284 = vmatpush.msrb.mxu2 %v263_v2  ;;  %v350_v21 = vld [vmem:[#allocation2 + $0xe0] sm:$0xff]  ;;  %v257_v22 = vld [vmem:[%s813_s7 + $0x38] sm:$0xff]  ;;  %v329_v24 = vld [vmem:[#allocation2 + $0x38] sm:$0xff] }
  0x21   :  { %105 = vmatpush.msra.mxu0 %v52_v31  ;;  %214 = vmatpush.msrb.mxu3 %v174_v54  ;;  %v277_v23 = vld [vmem:[%s813_s7 + $0xd8] sm:$0xff]  ;;  %v349_v25 = vld [vmem:[#allocation2 + $0xd8] sm:$0xff]  ;;  %v256_v26 = vld [vmem:[%s813_s7 + $0x30] sm:$0xff] }
  0x22   :  { %125 = vmatpush.msra.mxu1 %v68_v32  ;;  %285 = vmatpush.msrb.mxu2 %v262_v6  ;;  %v276_v27 = vld [vmem:[%s813_s7 + $0xd0] sm:$0xff]  ;;  %v328_v28 = vld [vmem:[#allocation2 + $0x30] sm:$0xff]  ;;  %v255_v30 = vld [vmem:[%s813_s7 + $0x28] sm:$0xff] }
  0x23   :  { %106 = vmatpush.msra.mxu0 %v51_v33  ;;  %215 = vmatpush.msrb.mxu3 %v172_v55  ;;  %v348_v29 = vld [vmem:[#allocation2 + $0xd0] sm:$0xff]  ;;  %v275_v31 = vld [vmem:[%s813_s7 + $0xc8] sm:$0xff]  ;;  %v327_v32 = vld [vmem:[#allocation2 + $0x28] sm:$0xff] }
  0x24   :  { %126 = vmatpush.msra.mxu1 %v67_v34  ;;  %286 = vmatpush.msrb.mxu2 %v261_v8  ;;  %v347_v33 = vld [vmem:[#allocation2 + $0xc8] sm:$0xff]  ;;  %v254_v34 = vld [vmem:[%s813_s7 + $0x20] sm:$0xff]  ;;  %v273_v39 = vld [vmem:[%s813_s7 + $0xb8] sm:$0xff] }
  0x25   :  { %107 = vmatpush.msra.mxu0 %v50_v35  ;;  %216 = vmatpush.msrb.mxu3 %v170_v56  ;;  %v274_v35 = vld [vmem:[%s813_s7 + $0xc0] sm:$0xff]  ;;  %v252_v42 = vld [vmem:[%s813_s7 + $0x10] sm:$0xff]  ;;  %v324_v44 = vld [vmem:[#allocation2 + $0x10] sm:$0xff] }
  0x26   :  { %127 = vmatpush.msra.mxu1 %v66_v36  ;;  %108 = vmatmul.f32.vlgmr.msra.gmra.mxu0 %v88_v37  ;;  %v326_v36 = vld [vmem:[#allocation2 + $0x20] sm:$0xff]  ;;  %v325_v40 = vld [vmem:[#allocation2 + $0x18] sm:$0xff]  ;;  %v272_v43 = vld [vmem:[%s813_s7 + $0xb0] sm:$0xff] }
  0x27   :  { %128 = vmatmul.f32.vlgmr.msra.gmra.mxu1 %v89_v38  ;;  %354 = vmatpush.msrb.mxu0 %v337_v63  ;;  %v346_v37 = vld [vmem:[#allocation2 + $0xc0] sm:$0xff]  ;;  %v253_v38 = vld [vmem:[%s813_s7 + $0x18] sm:$0xff]  ;;  %v345_v41 = vld [vmem:[#allocation2 + $0xb8] sm:$0xff] }
  0x28   :  { %374 = vmatpush.msrb.mxu1 %v353_v5  ;;  %287 = vmatpush.msrb.mxu2 %v260_v10  ;;  %v270_v51 = vld [vmem:[%s813_s7 + $0xa0] sm:$0xff]  ;;  %v322_v52 = vld [vmem:[#allocation2] sm:$0xff]  ;;  %v269_v54 = vld [vmem:[%s813_s7 + $0x98] sm:$0xff] }
  0x29   :  { %355 = vmatpush.msrb.mxu0 %v336_v1  ;;  %v342_v53 = vld [vmem:[#allocation2 + $0xa0] sm:$0xff]  ;;  %v341_v55 = vld [vmem:[#allocation2 + $0x98] sm:$0xff]  ;;  %v268_v56 = vld [vmem:[%s813_s7 + $0x90] sm:$0xff] }
  0x2a   :  { %375 = vmatpush.msrb.mxu1 %v352_v13  ;;  %288 = vmatpush.msrb.mxu2 %v259_v14  ;;  %v338_v62 = vld [vmem:[#allocation2 + $0x80] sm:$0xff] }
  0x2b   :  { %356 = vmatpush.msrb.mxu0 %v335_v3 }
  0x2c   :  { %376 = vmatpush.msrb.mxu1 %v351_v17  ;;  %289 = vmatpush.msrb.mxu2 %v258_v18 }
  0x2d   :  { %357 = vmatpush.msrb.mxu0 %v334_v7 }
  0x2e   :  { %377 = vmatpush.msrb.mxu1 %v350_v21  ;;  %290 = vmatpush.msrb.mxu2 %v257_v22 }
  0x2f   :  { %358 = vmatpush.msrb.mxu0 %v333_v9 }
  0x30   :  { %378 = vmatpush.msrb.mxu1 %v349_v25  ;;  %291 = vmatpush.msrb.mxu2 %v256_v26 }
  0x31   :  { %359 = vmatpush.msrb.mxu0 %v332_v12 }
  0x32   :  { %379 = vmatpush.msrb.mxu1 %v348_v29  ;;  %292 = vmatpush.msrb.mxu2 %v255_v30 }
  0x33   :  { %360 = vmatpush.msrb.mxu0 %v331_v16 }
  0x34   :  { %380 = vmatpush.msrb.mxu1 %v347_v33  ;;  %293 = vmatpush.msrb.mxu2 %v254_v34 }
  0x35   :  { %361 = vmatpush.msrb.mxu0 %v330_v20 }
  0x36   :  { %381 = vmatpush.msrb.mxu1 %v346_v37  ;;  %294 = vmatpush.msrb.mxu2 %v253_v38 }
  0x37   :  { %362 = vmatpush.msrb.mxu0 %v329_v24 }
  0x38   :  { %382 = vmatpush.msrb.mxu1 %v345_v41  ;;  %295 = vmatpush.msrb.mxu2 %v252_v42 }
  0x39   :  { %363 = vmatpush.msrb.mxu0 %v328_v28 }
  0x3b   :  { %364 = vmatpush.msrb.mxu0 %v327_v32 }
  0x3d   :  { %365 = vmatpush.msrb.mxu0 %v326_v36 }
  0x3f   :  { %366 = vmatpush.msrb.mxu0 %v325_v40 }
  0x41   :  { %367 = vmatpush.msrb.mxu0 %v324_v44 }
  0xa3   :  { %v109_v46 = vpop.f32.mrf.mxu0 }
  0xa4   :  { %v129_v47 = vpop.f32.mrf.mxu1  ;;  %v110_v48 = vadd.f32 %v434_v45, %v109_v46  ;;  %v344_v45 = vld [vmem:[#allocation2 + $0xb0] sm:$0xff]  ;;  %v251_v46 = vld [vmem:[%s813_s7 + $0x8] sm:$0xff] }
  0xa5   :  { %383 = vmatpush.msrb.mxu1 %v344_v45  ;;  %296 = vmatpush.msrb.mxu2 %v251_v46 }
  0xa6   :  { %v130_v49 = vadd.f32 %v129_v47, %v110_v48  ;;  %v271_v47 = vld [vmem:[%s813_s7 + $0xa8] sm:$0xff]  ;;  %v323_v48 = vld [vmem:[#allocation2 + $0x8] sm:$0xff] }
  0xa7   :  { %368 = vmatpush.msrb.mxu0 %v323_v48 }
  0xa8   :  { %v132_v50 = vmax.f32 %v130_v49, 0.0  ;;  %v343_v49 = vld [vmem:[#allocation2 + $0xa8] sm:$0xff] }
  0xa9   :  { %384 = vmatpush.msrb.mxu1 %v343_v49  ;;  %369 = vmatpush.msrb.mxu0 %v322_v52 }
  0xaa   :  { %427 = vmatmul.msk.f32.vlgmr.msra.gmra.mxu2 %vm145_vm0, %v132_v50  ;;  %v250_v50 = vld [vmem:[%s813_s7] sm:$0xff] }
  0xab   :  { %297 = vmatpush.msrb.mxu2 %v250_v50  ;;  %385 = vmatpush.msrb.mxu1 %v342_v53 }
  0xad   :  { %386 = vmatpush.msrb.mxu1 %v341_v55 }
 0x12d   :  { %v166_v58 = vpop.f32.mrf.mxu2 }
 0x12e   :  { %v167_v59 = vadd.f32 %v435_v57, %v166_v58  ;;  %v340_v57 = vld [vmem:[#allocation2 + $0x90] sm:$0xff]  ;;  %v226_v58 = vld [vmem:[%s812_s6] sm:$0x3]  ;;  %s497_s6 = smov [#allocation5]  }
 0x12f   :  { %387 = vmatpush.msrb.mxu1 %v340_v57  ;;  %v228_v63 = vperm.slane %v226_v58, 0  ;;  %v229_v5 = vperm.slane %v226_v58, 1 }
 0x130   :  { %428 = vmatmul.msk.f32.vlgmr.msra.gmra.mxu3 %vm177_vm1, %v167_v59  ;;  %v221_v60 = vmul.f32 %v167_v59, %v167_v59 }
 0x131   :  { %302 = vmatpush.msra.mxu3 %v281_v4 }
 0x132   :  { %v223_v61 = vsel %vm222_vm2, %v221_v60, 0.0  ;;  %v339_v60 = vld [vmem:[#allocation2 + $0x88] sm:$0xff] }
 0x133   :  { %224 = vadd.xlane.f32.xlu0 %v223_v61  ;;  %303 = vmatpush.msra.mxu3 %v280_v11  ;;  %v266_v61 = vld [vmem:[%s813_s7 + $0x80] sm:$0xff] }
 0x134   :  { %388 = vmatpush.msrb.mxu1 %v339_v60 }
 0x135   :  { %304 = vmatpush.msra.mxu3 %v279_v15 }
 0x136   :  { %389 = vmatpush.msrb.mxu1 %v338_v62 }
 0x137   :  { %305 = vmatpush.msra.mxu3 %v278_v19 }
 0x138   :  { %429 = vmatmul.msk.f32.vlgmr.msrb.gmra.mxu3 %vm177_vm1, %v167_v59  ;;  %v267_v59 = vld [vmem:[%s813_s7 + $0x88] sm:$0xff]  ;;  %s415_s7 = sshll.u32 %s497_s6, 4  ;;  %s416_s7 = int_to_ptr.vmem [resolvable:$true] %s415_s7 }
 0x139   :  { %306 = vmatpush.msra.mxu3 %v277_v23 }
 0x13b   :  { %307 = vmatpush.msra.mxu3 %v276_v27 }
 0x13d   :  { %308 = vmatpush.msra.mxu3 %v275_v31 }
 0x13f   :  { %309 = vmatpush.msra.mxu3 %v274_v35 }
 0x141   :  { %310 = vmatpush.msra.mxu3 %v273_v39 }
 0x143   :  { %311 = vmatpush.msra.mxu3 %v272_v43 }
 0x145   :  { %312 = vmatpush.msra.mxu3 %v271_v47 }
 0x147   :  { %313 = vmatpush.msra.mxu3 %v270_v51 }
 0x149   :  { %314 = vmatpush.msra.mxu3 %v269_v54 }
 0x14b   :  { %315 = vmatpush.msra.mxu3 %v268_v56 }
 0x14d   :  { %316 = vmatpush.msra.mxu3 %v267_v59 }
 0x14f   :  { %317 = vmatpush.msra.mxu3 %v266_v61 }
 0x1a6   :  { %v225_v0 = vpop.xlane.xlu0 %224 }
 0x1a7   :  { %v232_v2 = vadd.f32 %v228_v63, %v225_v0  ;;  %v233_v9 = vadd.f32 %v229_v5, %v225_v0 }
 0x1b3   :  { %v198_v1 = vpop.f32.mrf.mxu3 }
 0x1b4   :  { %v234_v3 = vmul.f32 2.0, %v198_v1 }
 0x1b6   :  { %v236_v4 = vsub.f32 %v232_v2, %v234_v3 }
 0x1b8   :  { %v238_v6 = vmax.f32 %v236_v4, 0.0 }
 0x1ba   :  { %v240_v7 = vadd.f32 0.001, %v238_v6 }
 0x1bb   :  { %v218_v8 = vpop.f32.mrf.mxu3 }
 0x1bc   :  { %436 = vrcp.f32 %v240_v7  ;;  %v235_v10 = vmul.f32 2.0, %v218_v8 }
 0x1be   :  { %v237_v11 = vsub.f32 %v233_v9, %v235_v10 }
 0x1c0   :  { %v239_v12 = vmax.f32 %v237_v11, 0.0 }
 0x1c2   :  { %v437_v13 = vpop.eup %436  ;;  %v241_v14 = vadd.f32 0.001, %v239_v12 }
 0x1c3   :  { %v244_v15 = vmul.f32 %v437_v13, %v240_v7 }
 0x1c4   :  { %438 = vrcp.f32 %v241_v14 }
 0x1c5   :  { %v246_v16 = vsub.f32 2.0, %v244_v15 }
 0x1c7   :  { %v248_v17 = vmul.f32 %v437_v13, %v246_v16 }
 0x1c9   :  { %298 = vmatmul.f32.vlgmr.msrb.gmra.mxu2 %v248_v17  ;;  %370 = vmatmul.f32.vlgmr.msrb.gmra.mxu0 %v248_v17 }
 0x1ca   :  { %v439_v18 = vpop.eup %438 }
 0x1cb   :  { %v245_v19 = vmul.f32 %v439_v18, %v241_v14 }
 0x1cd   :  { %v247_v20 = vsub.f32 2.0, %v245_v19 }
 0x1cf   :  { %v249_v21 = vmul.f32 %v439_v18, %v247_v20 }
 0x1d1   :  { %318 = vmatmul.f32.vlgmr.msra.gmra.mxu3 %v249_v21  ;;  %390 = vmatmul.f32.vlgmr.msrb.gmra.mxu1 %v249_v21 }
 0x246   :  { %v371_v22 = vpop.f32.mrf.mxu0 }
 0x24c   :  { %v299_v33 = vpop.f32.mrf.mxu2 }
 0x24e   :  { %v391_v23 = vpop.f32.mrf.mxu1 }
 0x24f   :  { %v392_v24 = vadd.f32 %v391_v23, %v371_v22 }
 0x251   :  { %440 = vrcp.f32 %v392_v24  ;;  %v405_v28 = vand.u32 2147483648, %v392_v24  ;;  %v403_v30 = vand.u32 2147483647, %v392_v24  ;;  %vm399_vm4 = vweird.f32 %v392_v24 }
 0x253   :  { %v406_v34 = vor.u32 1.1754944e-38, %v405_v28  ;;  %vm404_vm6 = vcmp.eq.f32.partialorder %v403_v30, 8.507059e+37 }
 0x254   :  { %v319_v31 = vpop.f32.mrf.mxu3 }
 0x255   :  { %v320_v35 = vadd.f32 %v319_v31, %v299_v33 }
 0x257   :  { %v441_v25 = vpop.eup %440 }
 0x258   :  { %v395_v26 = vmul.f32 %v441_v25, %v392_v24  ;;  %vm400_vm3 = vweird.f32 %v441_v25 }
 0x259   :  { %vm401_vm5 = vmor %vm399_vm4, %vm400_vm3 }
 0x25a   :  { %v396_v27 = vsub.f32 1.0, %v395_v26 }
 0x25c   :  { %v397_v29 = vmul.f32 %v441_v25, %v396_v27 }
 0x25e   :  { %v398_v32 = vadd.f32 %v441_v25, %v397_v29 }
 0x260   :  { %v402_v36 = vsel %vm401_vm5, %v441_v25, %v398_v32 }
 0x261   :  { %v407_v37 = vsel %vm404_vm6, %v406_v34, %v402_v36 }
 0x262   :  { %v408_v38 = vmul.f32 %v407_v37, %v320_v35 }
 0x264   :  { %409 = vst [vmem:[#allocation5] sm:$0x3] %v408_v38 }
 0x265   :  { %420 = dma.vmem_to_hbm [thread:$0]  %s416_s7, 32, %s418_s10, [#allocation4]  }
 0x266   :  { %492 = dma.done.wait [#allocation4], 32  }
 0x267   :  { %493 = vsyncadd [#allocation4], 4294967264 }
 0x268   :  { %425 = vsyncpa [#allocation3], 1 }
 0x269   :  { %426 = vsyncpa [#allocation4], 1 }

</bundles_post_ra>
